<compile_context>
chip_gen: v5e
topology: v5e:2x2
jax: 0.10.0
libtpu: 0.0.40
codegen_flags: <defaults>
</compile_context>

<pallas_src>
import functools

import jax
import jax.numpy as jnp
from jax.experimental import pallas as pl
from jax.experimental.pallas import tpu as pltpu

BN_EPS = 1e-5


def _round_up(x, n):
    return (x + n - 1) // n * n


def conv_stats_kernel(p_ref, w_ref, y_ref, s1_ref, s2_ref):
    """Pass 1: conv tile on the MXU, emit y plus per-channel sum / sum-of-squares."""
    y = jnp.dot(p_ref[...], w_ref[...], preferred_element_type=jnp.float32)  # (TM, Cp)
    y_ref[...] = y
    s1 = jnp.sum(y, axis=0, keepdims=True)        # (1, Cp)
    s2 = jnp.sum(y * y, axis=0, keepdims=True)    # (1, Cp)
    # Broadcast to the (8, Cp) output block so the store stays sublane-aligned.
    s1_ref[...] = jnp.broadcast_to(s1, s1_ref.shape)
    s2_ref[...] = jnp.broadcast_to(s2, s2_ref.shape)


def bn_relu_apply_kernel(y_ref, scale_ref, shift_ref, o_ref):
    """Pass 2: apply folded BN affine + ReLU (pure elementwise, mem-bound)."""
    # TODO(synk): `activation` is a constructor arg in the PyTorch module; ReLU is
    # hardcoded here (swap jnp.maximum for other activations).
    o_ref[...] = jnp.maximum(y_ref[...] * scale_ref[...] + shift_ref[...], 0.0)


def _im2col_nchw(x_nchw, kh, kw, stride, padding):
    """NCHW -> (N*Ho*Wo, kh*kw*Cin) patches with (kh, kw, c_in) ordering."""
    # TODO(synk): fully fuse patch extraction into the kernel (shifted-window
    # index maps over an NHWC input) to avoid the kh*kw-duplicated HBM slab.
    x = jnp.transpose(x_nchw, (0, 2, 3, 1))  # NHWC
    x = jnp.pad(x, ((0, 0), (padding, padding), (padding, padding), (0, 0)))
    n, hp, wp, c = x.shape
    ho = (hp - kh) // stride + 1
    wo = (wp - kw) // stride + 1
    cols = []
    for i in range(kh):
        for j in range(kw):
            cols.append(x[:, i:i + ho * stride:stride, j:j + wo * stride:stride, :])
    patches = jnp.concatenate(cols, axis=-1)  # (N, Ho, Wo, kh*kw*Cin)
    return patches.reshape(n * ho * wo, kh * kw * c), ho, wo


@functools.partial(jax.jit, static_argnames=("stride", "padding", "tm"))
def conv_bn_relu(x_nchw, weight_oihw, gamma, beta, *, stride=1, padding=0, tm=256):
    # tm: rows of the im2col matrix per grid step.  256 is friendly to v5e's
    # smaller MXU / single vst slot; bump to 512-1024 on v6e/v7x for large M.
    assert tm % 8 == 0
    n = x_nchw.shape[0]
    c_out, c_in, kh, kw = weight_oihw.shape

    patches, ho, wo = _im2col_nchw(x_nchw, kh, kw, stride, padding)
    m, k = patches.shape

    # Lane/sublane-dense padding.
    c_pad = _round_up(c_out, 128)
    k_pad = _round_up(k, 128)
    m_pad = _round_up(m, tm)
    n_tiles = m_pad // tm

    # bf16 MXU operands (f32 accumulation inside the kernel).
    patches_p = jnp.pad(patches.astype(jnp.bfloat16),
                        ((0, m_pad - m), (0, k_pad - k)))
    # (Cout, Cin, KH, KW) -> (KH, KW, Cin, Cout) -> (K, Cout), matching patch order.
    w2d = jnp.transpose(weight_oihw, (2, 3, 1, 0)).reshape(k, c_out)
    w_p = jnp.pad(w2d.astype(jnp.bfloat16),
                  ((0, k_pad - k), (0, c_pad - c_out)))
    # Pad gamma with 1 and beta with 0 so padded channels stay finite (sliced off).
    gamma_p = jnp.pad(gamma.astype(jnp.float32), (0, c_pad - c_out),
                      constant_values=1.0)
    beta_p = jnp.pad(beta.astype(jnp.float32), (0, c_pad - c_out))

    # ---- Pass 1: conv matmul, emit y + per-tile partial BN statistics.
    y2d, s1_t, s2_t = pl.pallas_call(
        conv_stats_kernel,
        out_shape=(jax.ShapeDtypeStruct((m_pad, c_pad), jnp.float32),
                   jax.ShapeDtypeStruct((n_tiles * 8, c_pad), jnp.float32),
                   jax.ShapeDtypeStruct((n_tiles * 8, c_pad), jnp.float32)),
        grid=(n_tiles,),
        in_specs=[pl.BlockSpec((tm, k_pad), lambda i: (i, 0)),
                  pl.BlockSpec((k_pad, c_pad), lambda i: (0, 0))],
        out_specs=(pl.BlockSpec((tm, c_pad), lambda i: (i, 0)),
                   pl.BlockSpec((8, c_pad), lambda i: (i, 0)),
                   pl.BlockSpec((8, c_pad), lambda i: (i, 0))),
        compiler_params=pltpu.CompilerParams(
            dimension_semantics=("parallel",)),
    )(patches_p, w_p)

    # Zero-padded patch rows contribute exactly 0 to both sums, so dividing by the
    # real row count m gives exact train-mode (biased) batch statistics.
    # TODO(synk): eval-mode BatchNorm (running stats) not implemented; this matches
    # the module's default training-mode forward.
    s1 = jnp.sum(s1_t.reshape(n_tiles, 8, c_pad)[:, 0, :], axis=0)
    s2 = jnp.sum(s2_t.reshape(n_tiles, 8, c_pad)[:, 0, :], axis=0)
    inv_m = 1.0 / float(m)
    mean = s1 * inv_m
    var = jnp.maximum(s2 * inv_m - mean * mean, 0.0)      # biased variance
    inv_std = jax.lax.rsqrt(var + BN_EPS)                  # tiny (Cp,) vector
    scale = (gamma_p * inv_std).reshape(1, c_pad)          # folded BN affine
    shift = (beta_p - mean * gamma_p * inv_std).reshape(1, c_pad)

    # ---- Pass 2: elementwise folded-BN affine + ReLU over y (lane-dense output).
    out2d = pl.pallas_call(
        bn_relu_apply_kernel,
        out_shape=jax.ShapeDtypeStruct((m_pad, c_pad), jnp.float32),
        grid=(n_tiles,),
        in_specs=[pl.BlockSpec((tm, c_pad), lambda i: (i, 0)),
                  pl.BlockSpec((1, c_pad), lambda i: (0, 0)),
                  pl.BlockSpec((1, c_pad), lambda i: (0, 0))],
        out_specs=pl.BlockSpec((tm, c_pad), lambda i: (i, 0)),
        compiler_params=pltpu.CompilerParams(
            dimension_semantics=("parallel",)),
    )(y2d, scale, shift)

    # (M_pad, C_pad) -> slice real rows/channels -> (N, Ho, Wo, Cout) -> NCHW
    out = out2d[:m, :c_out].reshape(n, ho, wo, c_out)
    return jnp.transpose(out, (0, 3, 1, 2))


def _reference(x_nchw, weight_oihw, gamma, beta, *, stride, padding):
    y = jax.lax.conv_general_dilated(
        x_nchw.astype(jnp.float32), weight_oihw.astype(jnp.float32),
        window_strides=(stride, stride),
        padding=[(padding, padding), (padding, padding)],
        dimension_numbers=("NCHW", "OIHW", "NCHW"))
    mean = jnp.mean(y, axis=(0, 2, 3), keepdims=True)
    var = jnp.mean((y - mean) ** 2, axis=(0, 2, 3), keepdims=True)
    y_hat = (y - mean) * jax.lax.rsqrt(var + BN_EPS)
    out = y_hat * gamma.reshape(1, -1, 1, 1) + beta.reshape(1, -1, 1, 1)
    return jnp.maximum(out, 0.0)


if __name__ == "__main__":
    # ConvBnReLU(in_channels=4, out_channels=8, kernel_size=3, activation=ReLU,
    #            stride=1, padding=1)
    N, C_IN, H, W = 2, 4, 16, 16
    C_OUT, K = 8, 3
    STRIDE, PAD = 1, 1

    key = jax.random.PRNGKey(0)
    kx, kw_, kg, kb = jax.random.split(key, 4)

    x = jax.random.normal(kx, (N, C_IN, H, W), dtype=jnp.float32)
    weight = jax.random.normal(kw_, (C_OUT, C_IN, K, K), dtype=jnp.float32) * 0.1
    gamma = 1.0 + 0.1 * jax.random.normal(kg, (C_OUT,), dtype=jnp.float32)
    beta = 0.1 * jax.random.normal(kb, (C_OUT,), dtype=jnp.float32)

    out = conv_bn_relu(x, weight, gamma, beta, stride=STRIDE, padding=PAD)
    out = jax.block_until_ready(out)
    assert out.shape == (N, C_OUT, H, W)

    # Tight check against a reference whose conv operands are rounded to bf16
    # (matches the kernel's MXU operand precision; accumulation is f32 in both).
    x_bf = x.astype(jnp.bfloat16).astype(jnp.float32)
    w_bf = weight.astype(jnp.bfloat16).astype(jnp.float32)
    ref_bf = _reference(x_bf, w_bf, gamma, beta, stride=STRIDE, padding=PAD)
    max_err_bf = float(jnp.max(jnp.abs(out - ref_bf)))
    assert jnp.allclose(out, ref_bf, atol=1e-3, rtol=1e-3), max_err_bf

    # Sanity check against the exact f32 module forward (difference bounded by the
    # bf16 rounding of the MXU operands).
    ref = _reference(x, weight, gamma, beta, stride=STRIDE, padding=PAD)
    max_err_f32 = float(jnp.max(jnp.abs(out - ref)))
    assert max_err_f32 < 1e-1, max_err_f32

    print("KERNEL_OK")
</pallas_src>

<mosaic_0001>
module attributes {stable_mosaic.version = 11 : i64} {
  func.func @conv_stats_kernel(%arg0: i32, %arg1: memref<256x128xbf16, #tpu.memory_space<vmem>>, %arg2: memref<128x128xbf16, #tpu.memory_space<vmem>>, %arg3: memref<256x128xf32, #tpu.memory_space<vmem>>, %arg4: memref<8x128xf32, #tpu.memory_space<vmem>>, %arg5: memref<8x128xf32, #tpu.memory_space<vmem>>) attributes {dimension_semantics = [#tpu.dimension_semantics<parallel>], iteration_bounds = array<i64: 2>, scalar_prefetch = 0 : i64, scratch_operands = 0 : i64, tpu.core_type = #tpu.core_type<tc>, window_params = [{transform_indices = @transform_0, window_bounds = array<i64: 256, 128>}, {pipeline_mode = #tpu.pipeline_mode<synchronous>, transform_indices = @transform_1, window_bounds = array<i64: 128, 128>}, {transform_indices = @transform_2, window_bounds = array<i64: 256, 128>}, {transform_indices = @transform_3, window_bounds = array<i64: 8, 128>}, {transform_indices = @transform_4, window_bounds = array<i64: 8, 128>}]} {
    %c0 = arith.constant 0 : index
    %c0_0 = arith.constant 0 : index
    %0 = vector.load %arg1[%c0, %c0_0] : memref<256x128xbf16, #tpu.memory_space<vmem>>, vector<256x128xbf16>
    %c0_1 = arith.constant 0 : index
    %c0_2 = arith.constant 0 : index
    %1 = vector.load %arg2[%c0_1, %c0_2] : memref<128x128xbf16, #tpu.memory_space<vmem>>, vector<128x128xbf16>
    %cst = arith.constant dense<0.000000e+00> : vector<256x128xf32>
    %2 = tpu.matmul %0, %1, %cst {dimension_numbers = #tpu.dot_dimension_numbers<[1], [0], [0], [1], [0, 0, 1, 1], [], []>} : vector<256x128xbf16>, vector<128x128xbf16>, vector<256x128xf32> -> vector<256x128xf32>
    %c0_3 = arith.constant 0 : index
    %c0_4 = arith.constant 0 : index
    %3 = vector.load %arg3[%c0_3, %c0_4] : memref<256x128xf32, #tpu.memory_space<vmem>>, vector<256x128xf32>
    tpu.vector_store %arg3[%c0_3, %c0_4], %2 {strides = array<i32>} : memref<256x128xf32, #tpu.memory_space<vmem>>, vector<256x128xf32>,
    %cst_5 = arith.constant dense<0.000000e+00> : vector<128xf32>
    %4 = vector.multi_reduction <add>, %2, %cst_5 [0] : vector<256x128xf32> to vector<128xf32>
    %5 = vector.shape_cast %4 : vector<128xf32> to vector<1x128xf32>
    %6 = arith.mulf %2, %2 : vector<256x128xf32>
    %cst_6 = arith.constant dense<0.000000e+00> : vector<128xf32>
    %7 = vector.multi_reduction <add>, %6, %cst_6 [0] : vector<256x128xf32> to vector<128xf32>
    %8 = vector.shape_cast %7 : vector<128xf32> to vector<1x128xf32>
    %9 = vector.shape_cast %5 : vector<1x128xf32> to vector<1x128xf32>
    %10 = vector.broadcast %9 : vector<1x128xf32> to vector<8x128xf32>
    %c0_7 = arith.constant 0 : index
    %c0_8 = arith.constant 0 : index
    %11 = vector.load %arg4[%c0_7, %c0_8] : memref<8x128xf32, #tpu.memory_space<vmem>>, vector<8x128xf32>
    tpu.vector_store %arg4[%c0_7, %c0_8], %10 {strides = array<i32>} : memref<8x128xf32, #tpu.memory_space<vmem>>, vector<8x128xf32>,
    %12 = vector.shape_cast %8 : vector<1x128xf32> to vector<1x128xf32>
    %13 = vector.broadcast %12 : vector<1x128xf32> to vector<8x128xf32>
    %c0_9 = arith.constant 0 : index
    %c0_10 = arith.constant 0 : index
    %14 = vector.load %arg5[%c0_9, %c0_10] : memref<8x128xf32, #tpu.memory_space<vmem>>, vector<8x128xf32>
    tpu.vector_store %arg5[%c0_9, %c0_10], %13 {strides = array<i32>} : memref<8x128xf32, #tpu.memory_space<vmem>>, vector<8x128xf32>,
    return
  }
  func.func @transform_0(%arg0: i32) -> (i32, i32) {
    %c0_i32 = arith.constant 0 : i32
    %c0_i32_0 = arith.constant 0 : i32
    return %arg0, %c0_i32 : i32, i32
  }
  func.func @transform_1(%arg0: i32) -> (i32, i32) {
    %c0_i32 = arith.constant 0 : i32
    %c0_i32_0 = arith.constant 0 : i32
    %c0_i32_1 = arith.constant 0 : i32
    return %c0_i32, %c0_i32_0 : i32, i32
  }
  func.func @transform_2(%arg0: i32) -> (i32, i32) {
    %c0_i32 = arith.constant 0 : i32
    %c0_i32_0 = arith.constant 0 : i32
    return %arg0, %c0_i32 : i32, i32
  }
  func.func @transform_3(%arg0: i32) -> (i32, i32) {
    %c0_i32 = arith.constant 0 : i32
    %c0_i32_0 = arith.constant 0 : i32
    return %arg0, %c0_i32 : i32, i32
  }
  func.func @transform_4(%arg0: i32) -> (i32, i32) {
    %c0_i32 = arith.constant 0 : i32
    %c0_i32_0 = arith.constant 0 : i32
    return %arg0, %c0_i32 : i32, i32
  }
}

module attributes {stable_mosaic.version = 11 : i64} {
  func.func @bn_relu_apply_kernel(%arg0: i32, %arg1: memref<256x128xf32, #tpu.memory_space<vmem>>, %arg2: memref<1x128xf32, #tpu.memory_space<vmem>>, %arg3: memref<1x128xf32, #tpu.memory_space<vmem>>, %arg4: memref<256x128xf32, #tpu.memory_space<vmem>>) attributes {dimension_semantics = [#tpu.dimension_semantics<parallel>], iteration_bounds = array<i64: 2>, scalar_prefetch = 0 : i64, scratch_operands = 0 : i64, tpu.core_type = #tpu.core_type<tc>, window_params = [{transform_indices = @transform_0, window_bounds = array<i64: 256, 128>}, {pipeline_mode = #tpu.pipeline_mode<synchronous>, transform_indices = @transform_1, window_bounds = array<i64: 1, 128>}, {pipeline_mode = #tpu.pipeline_mode<synchronous>, transform_indices = @transform_2, window_bounds = array<i64: 1, 128>}, {transform_indices = @transform_3, window_bounds = array<i64: 256, 128>}]} {
    %c0 = arith.constant 0 : index
    %c0_0 = arith.constant 0 : index
    %0 = vector.load %arg1[%c0, %c0_0] : memref<256x128xf32, #tpu.memory_space<vmem>>, vector<256x128xf32>
    %c0_1 = arith.constant 0 : index
    %c0_2 = arith.constant 0 : index
    %1 = vector.load %arg2[%c0_1, %c0_2] : memref<1x128xf32, #tpu.memory_space<vmem>>, vector<1x128xf32>
    %2 = vector.broadcast %1 : vector<1x128xf32> to vector<256x128xf32>
    %3 = arith.mulf %0, %2 : vector<256x128xf32>
    %c0_3 = arith.constant 0 : index
    %c0_4 = arith.constant 0 : index
    %4 = vector.load %arg3[%c0_3, %c0_4] : memref<1x128xf32, #tpu.memory_space<vmem>>, vector<1x128xf32>
    %5 = vector.broadcast %4 : vector<1x128xf32> to vector<256x128xf32>
    %6 = arith.addf %3, %5 : vector<256x128xf32>
    %cst = arith.constant 0.000000e+00 : f32
    %7 = vector.broadcast %cst : f32 to vector<256x128xf32>
    %8 = arith.maximumf %6, %7 : vector<256x128xf32>
    %c0_5 = arith.constant 0 : index
    %c0_6 = arith.constant 0 : index
    %9 = vector.load %arg4[%c0_5, %c0_6] : memref<256x128xf32, #tpu.memory_space<vmem>>, vector<256x128xf32>
    tpu.vector_store %arg4[%c0_5, %c0_6], %8 {strides = array<i32>} : memref<256x128xf32, #tpu.memory_space<vmem>>, vector<256x128xf32>,
    return
  }
  func.func @transform_0(%arg0: i32) -> (i32, i32) {
    %c0_i32 = arith.constant 0 : i32
    %c0_i32_0 = arith.constant 0 : i32
    return %arg0, %c0_i32 : i32, i32
  }
  func.func @transform_1(%arg0: i32) -> (i32, i32) {
    %c0_i32 = arith.constant 0 : i32
    %c0_i32_0 = arith.constant 0 : i32
    %c0_i32_1 = arith.constant 0 : i32
    return %c0_i32, %c0_i32_0 : i32, i32
  }
  func.func @transform_2(%arg0: i32) -> (i32, i32) {
    %c0_i32 = arith.constant 0 : i32
    %c0_i32_0 = arith.constant 0 : i32
    %c0_i32_1 = arith.constant 0 : i32
    return %c0_i32, %c0_i32_0 : i32, i32
  }
  func.func @transform_3(%arg0: i32) -> (i32, i32) {
    %c0_i32 = arith.constant 0 : i32
    %c0_i32_0 = arith.constant 0 : i32
    return %arg0, %c0_i32 : i32, i32
  }
}

</mosaic_0001>

<bundles_post_ra>
// kernel: conv_bn_relu.3
= control target key start
LH: loop header
LB: loop body
LE: loop exit
PB: predicated region body
PF: predicated region fallthrough
CT: control target
= control target key end

     0   :  { %s447_s12 = smov 0   ;;  %s606_s0 = inlined_call_operand.vmem [shape: f32[512,128], index: 0, kind: input, shape index: {}]   ;;  %s607_s1 = inlined_call_operand.vmem [shape: f32[1,128], index: 1, kind: input, shape index: {}]   ;;  %s608_s2 = inlined_call_operand.vmem [shape: f32[1,128], index: 2, kind: input, shape index: {}]   ;;  %s609_s3 = inlined_call_operand.vmem [shape: f32[512,128], index: 3, kind: output, shape index: {}]  }
   0x1 LB: > { %s398_s13 = sadd.s32 4294967295, %s425_s12   ;;  %p402_p0 = scmp.ge.s32.totalorder %s425_s12, 1  ;;  %s425_s12 = sphi %s447_s12, %s13_s12  }
   0x2   : > { %p138_p1 = scmp.lt.s32.totalorder %s425_s12, 3 }
   0x4   : > { %p139_p2 = pnand %p402_p0, %p138_p1 }
   0x5   : > { %s403_s14 = sshll.u32 (!%p139_p2), %s398_s13, 5 }
   0x6   : > { %142 = sbr.rel (%p139_p2) target bundleno = 53 (0x35), region = 32  ;;  %p163_p3 = scmp.lt.s32.totalorder (!%p139_p2), %s403_s14, 63 }
   0xb   : > { %s611_s14 = smov (!%p163_p3, %s403_s14), 63  ;;  %v458_v0 = vld [vmem:[%s607_s1] ss:$0 sm:$0xff] }
   0xc   : > { %s404_s17 = sshll.u32 %s611_s14, 3  ;;  %v468_v1 = vld [vmem:[%s608_s2] ss:$0 sm:$0xff] }
   0xd   : > { %s463_s20 = scalar_lea.vmem %s606_s0, %s404_s17  ;;  %s491_s25 = scalar_lea.vmem %s609_s3, %s404_s17 }
   0xe   : > { %v174_v2 = vld [vmem:[%s463_s20] sm:$0xff]  ;;  %v175_v3 = vld [vmem:[%s463_s20 + $0x8] sm:$0xff]  ;;  %v176_v4 = vld [vmem:[%s463_s20 + $0x10] sm:$0xff] }
   0xf   : > { %v210_v5 = vmul.f32 %v458_v0, %v174_v2  ;;  %v211_v6 = vmul.f32 %v458_v0, %v175_v3  ;;  %v212_v7 = vmul.f32 %v458_v0, %v176_v4  ;;  %v177_v8 = vld [vmem:[%s463_s20 + $0x18] sm:$0xff]  ;;  %v178_v9 = vld [vmem:[%s463_s20 + $0x20] sm:$0xff]  ;;  %v179_v10 = vld [vmem:[%s463_s20 + $0x28] sm:$0xff] }
  0x10   : > { %v213_v11 = vmul.f32 %v458_v0, %v177_v8  ;;  %v214_v12 = vmul.f32 %v458_v0, %v178_v9  ;;  %v215_v13 = vmul.f32 %v458_v0, %v179_v10  ;;  %v180_v14 = vld [vmem:[%s463_s20 + $0x30] sm:$0xff]  ;;  %v181_v15 = vld [vmem:[%s463_s20 + $0x38] sm:$0xff]  ;;  %v182_v24 = vld [vmem:[%s463_s20 + $0x40] sm:$0xff] }
  0x11   : > { %v246_v16 = vadd.f32 %v468_v1, %v210_v5  ;;  %v247_v17 = vadd.f32 %v468_v1, %v211_v6  ;;  %v248_v18 = vadd.f32 %v468_v1, %v212_v7  ;;  %v216_v19 = vmul.f32 %v458_v0, %v180_v14  ;;  %v183_v25 = vld [vmem:[%s463_s20 + $0x48] sm:$0xff]  ;;  %v184_v26 = vld [vmem:[%s463_s20 + $0x50] sm:$0xff]  ;;  %v185_v31 = vld [vmem:[%s463_s20 + $0x58] sm:$0xff] }
  0x12   : > { %v249_v20 = vadd.f32 %v468_v1, %v213_v11  ;;  %v250_v21 = vadd.f32 %v468_v1, %v214_v12  ;;  %v251_v22 = vadd.f32 %v468_v1, %v215_v13  ;;  %v217_v23 = vmul.f32 %v458_v0, %v181_v15  ;;  %v186_v32 = vld [vmem:[%s463_s20 + $0x60] sm:$0xff]  ;;  %v187_v33 = vld [vmem:[%s463_s20 + $0x68] sm:$0xff]  ;;  %v188_v37 = vld [vmem:[%s463_s20 + $0x70] sm:$0xff] }
  0x13   : > { %v278_v27 = vmax.f32 %v246_v16, 0.0  ;;  %v279_v28 = vmax.f32 %v247_v17, 0.0  ;;  %v280_v29 = vmax.f32 %v248_v18, 0.0  ;;  %v252_v30 = vadd.f32 %v468_v1, %v216_v19  ;;  %v189_v42 = vld [vmem:[%s463_s20 + $0x78] sm:$0xff]  ;;  %v190_v54 = vld [vmem:[%s463_s20 + $0x80] sm:$0xff]  ;;  %v191_v55 = vld [vmem:[%s463_s20 + $0x88] sm:$0xff] }
  0x14   : > { %v281_v34 = vmax.f32 %v249_v20, 0.0  ;;  %v282_v35 = vmax.f32 %v250_v21, 0.0  ;;  %v253_v36 = vadd.f32 %v468_v1, %v217_v23  ;;  %v283_v38 = vmax.f32 %v251_v22, 0.0  ;;  %v192_v56 = vld [vmem:[%s463_s20 + $0x90] sm:$0xff]  ;;  %v193_v59 = vld [vmem:[%s463_s20 + $0x98] sm:$0xff]  ;;  %v194_v63 = vld [vmem:[%s463_s20 + $0xa0] sm:$0xff] }
  0x15   : > { %310 = vst [vmem:[%s491_s25] sm:$0xff] %v278_v27  ;;  %v218_v39 = vmul.f32 %v458_v0, %v182_v24  ;;  %v219_v40 = vmul.f32 %v458_v0, %v183_v25  ;;  %v220_v41 = vmul.f32 %v458_v0, %v184_v26  ;;  %v284_v43 = vmax.f32 %v252_v30, 0.0  ;;  %v195_v6 = vld [vmem:[%s463_s20 + $0xa8] sm:$0xff]  ;;  %v196_v10 = vld [vmem:[%s463_s20 + $0xb0] sm:$0xff]  ;;  %v197_v14 = vld [vmem:[%s463_s20 + $0xb8] sm:$0xff] }
  0x16   : > { %311 = vst [vmem:[%s491_s25 + $0x8] sm:$0xff] %v279_v28  ;;  %v221_v44 = vmul.f32 %v458_v0, %v185_v31  ;;  %v222_v45 = vmul.f32 %v458_v0, %v186_v32  ;;  %v223_v46 = vmul.f32 %v458_v0, %v187_v33  ;;  %v224_v50 = vmul.f32 %v458_v0, %v188_v37  ;;  %v198_v18 = vld [vmem:[%s463_s20 + $0xc0] sm:$0xff]  ;;  %v199_v22 = vld [vmem:[%s463_s20 + $0xc8] sm:$0xff]  ;;  %v200_v26 = vld [vmem:[%s463_s20 + $0xd0] sm:$0xff] }
  0x17   : > { %312 = vst [vmem:[%s491_s25 + $0x10] sm:$0xff] %v280_v29  ;;  %v254_v47 = vadd.f32 %v468_v1, %v218_v39  ;;  %v255_v48 = vadd.f32 %v468_v1, %v219_v40  ;;  %v256_v49 = vadd.f32 %v468_v1, %v220_v41  ;;  %v285_v51 = vmax.f32 %v253_v36, 0.0  ;;  %v201_v30 = vld [vmem:[%s463_s20 + $0xd8] sm:$0xff] }
  0x18   : > { %313 = vst [vmem:[%s491_s25 + $0x18] sm:$0xff] %v281_v34  ;;  %v257_v52 = vadd.f32 %v468_v1, %v221_v44  ;;  %v225_v53 = vmul.f32 %v458_v0, %v189_v42  ;;  %v258_v58 = vadd.f32 %v468_v1, %v222_v45  ;;  %v259_v62 = vadd.f32 %v468_v1, %v223_v46  ;;  %v202_v34 = vld [vmem:[%s463_s20 + $0xe0] sm:$0xff]  ;;  %v204_v42 = vld [vmem:[%s463_s20 + $0xf0] sm:$0xff]  ;;  %v205_v46 = vld [vmem:[%s463_s20 + $0xf8] sm:$0xff] }
  0x19   : > { %314 = vst [vmem:[%s491_s25 + $0x20] sm:$0xff] %v282_v35  ;;  %v286_v57 = vmax.f32 %v254_v47, 0.0  ;;  %v287_v60 = vmax.f32 %v255_v48, 0.0  ;;  %v288_v61 = vmax.f32 %v256_v49, 0.0  ;;  %v260_v2 = vadd.f32 %v468_v1, %v224_v50 }
  0x1a   : > { %315 = vst [vmem:[%s491_s25 + $0x28] sm:$0xff] %v283_v38  ;;  %v226_v3 = vmul.f32 %v458_v0, %v190_v54  ;;  %v227_v4 = vmul.f32 %v458_v0, %v191_v55  ;;  %v228_v5 = vmul.f32 %v458_v0, %v192_v56  ;;  %v289_v7 = vmax.f32 %v257_v52, 0.0  ;;  %v203_v38 = vld [vmem:[%s463_s20 + $0xe8] sm:$0xff] }
  0x1b   : > { %316 = vst [vmem:[%s491_s25 + $0x30] sm:$0xff] %v284_v43  ;;  %v261_v8 = vadd.f32 %v468_v1, %v225_v53  ;;  %v229_v9 = vmul.f32 %v458_v0, %v193_v59  ;;  %v290_v11 = vmax.f32 %v258_v58, 0.0  ;;  %v230_v13 = vmul.f32 %v458_v0, %v194_v63 }
  0x1c   : > { %317 = vst [vmem:[%s491_s25 + $0x38] sm:$0xff] %v285_v51  ;;  %v262_v12 = vadd.f32 %v468_v1, %v226_v3  ;;  %v291_v15 = vmax.f32 %v259_v62, 0.0  ;;  %v263_v16 = vadd.f32 %v468_v1, %v227_v4  ;;  %v231_v17 = vmul.f32 %v458_v0, %v195_v6 }
  0x1d   : > { %318 = vst [vmem:[%s491_s25 + $0x40] sm:$0xff] %v286_v57  ;;  %v292_v19 = vmax.f32 %v260_v2, 0.0  ;;  %v264_v20 = vadd.f32 %v468_v1, %v228_v5  ;;  %v232_v21 = vmul.f32 %v458_v0, %v196_v10  ;;  %v293_v23 = vmax.f32 %v261_v8, 0.0 }
  0x1e   : > { %319 = vst [vmem:[%s491_s25 + $0x48] sm:$0xff] %v287_v60  ;;  %v265_v24 = vadd.f32 %v468_v1, %v229_v9  ;;  %v233_v25 = vmul.f32 %v458_v0, %v197_v14  ;;  %v294_v27 = vmax.f32 %v262_v12, 0.0  ;;  %v266_v28 = vadd.f32 %v468_v1, %v230_v13 }
  0x1f   : > { %320 = vst [vmem:[%s491_s25 + $0x50] sm:$0xff] %v288_v61  ;;  %v234_v29 = vmul.f32 %v458_v0, %v198_v18  ;;  %v295_v31 = vmax.f32 %v263_v16, 0.0  ;;  %v267_v32 = vadd.f32 %v468_v1, %v231_v17  ;;  %v235_v33 = vmul.f32 %v458_v0, %v199_v22 }
  0x20   : > { %321 = vst [vmem:[%s491_s25 + $0x58] sm:$0xff] %v289_v7  ;;  %v296_v35 = vmax.f32 %v264_v20, 0.0  ;;  %v268_v36 = vadd.f32 %v468_v1, %v232_v21  ;;  %v236_v37 = vmul.f32 %v458_v0, %v200_v26  ;;  %v297_v39 = vmax.f32 %v265_v24, 0.0 }
  0x21   : > { %322 = vst [vmem:[%s491_s25 + $0x60] sm:$0xff] %v290_v11  ;;  %v269_v40 = vadd.f32 %v468_v1, %v233_v25  ;;  %v237_v41 = vmul.f32 %v458_v0, %v201_v30  ;;  %v298_v43 = vmax.f32 %v266_v28, 0.0  ;;  %v270_v44 = vadd.f32 %v468_v1, %v234_v29 }
  0x22   : > { %323 = vst [vmem:[%s491_s25 + $0x68] sm:$0xff] %v291_v15  ;;  %v238_v45 = vmul.f32 %v458_v0, %v202_v34  ;;  %v299_v47 = vmax.f32 %v267_v32, 0.0  ;;  %v271_v48 = vadd.f32 %v468_v1, %v235_v33  ;;  %v239_v49 = vmul.f32 %v458_v0, %v203_v38 }
  0x23   : > { %324 = vst [vmem:[%s491_s25 + $0x70] sm:$0xff] %v292_v19  ;;  %v300_v50 = vmax.f32 %v268_v36, 0.0  ;;  %v272_v51 = vadd.f32 %v468_v1, %v236_v37  ;;  %v240_v52 = vmul.f32 %v458_v0, %v204_v42  ;;  %v301_v53 = vmax.f32 %v269_v40, 0.0 }
  0x24   : > { %325 = vst [vmem:[%s491_s25 + $0x78] sm:$0xff] %v293_v23  ;;  %v273_v54 = vadd.f32 %v468_v1, %v237_v41  ;;  %v241_v55 = vmul.f32 %v458_v0, %v205_v46  ;;  %v302_v56 = vmax.f32 %v270_v44, 0.0  ;;  %v274_v57 = vadd.f32 %v468_v1, %v238_v45 }
  0x25   : > { %326 = vst [vmem:[%s491_s25 + $0x80] sm:$0xff] %v294_v27  ;;  %v303_v58 = vmax.f32 %v271_v48, 0.0  ;;  %v275_v59 = vadd.f32 %v468_v1, %v239_v49  ;;  %v304_v60 = vmax.f32 %v272_v51, 0.0  ;;  %v276_v61 = vadd.f32 %v468_v1, %v240_v52 }
  0x26   : > { %327 = vst [vmem:[%s491_s25 + $0x88] sm:$0xff] %v295_v31  ;;  %v305_v0 = vmax.f32 %v273_v54, 0.0  ;;  %v277_v62 = vadd.f32 %v468_v1, %v241_v55  ;;  %v306_v63 = vmax.f32 %v274_v57, 0.0 }
  0x27   : > { %328 = vst [vmem:[%s491_s25 + $0x90] sm:$0xff] %v296_v35  ;;  %v307_v2 = vmax.f32 %v275_v59, 0.0  ;;  %v308_v3 = vmax.f32 %v276_v61, 0.0 }
  0x28   : > { %329 = vst [vmem:[%s491_s25 + $0x98] sm:$0xff] %v297_v39  ;;  %v309_v4 = vmax.f32 %v277_v62, 0.0 }
  0x29   : > { %330 = vst [vmem:[%s491_s25 + $0xa0] sm:$0xff] %v298_v43 }
  0x2a   : > { %331 = vst [vmem:[%s491_s25 + $0xa8] sm:$0xff] %v299_v47 }
  0x2b   : > { %332 = vst [vmem:[%s491_s25 + $0xb0] sm:$0xff] %v300_v50 }
  0x2c   : > { %333 = vst [vmem:[%s491_s25 + $0xb8] sm:$0xff] %v301_v53 }
  0x2d   : > { %334 = vst [vmem:[%s491_s25 + $0xc0] sm:$0xff] %v302_v56 }
  0x2e   : > { %335 = vst [vmem:[%s491_s25 + $0xc8] sm:$0xff] %v303_v58 }
  0x2f   : > { %336 = vst [vmem:[%s491_s25 + $0xd0] sm:$0xff] %v304_v60 }
  0x30   : > { %337 = vst [vmem:[%s491_s25 + $0xd8] sm:$0xff] %v305_v0 }
  0x31   : > { %338 = vst [vmem:[%s491_s25 + $0xe0] sm:$0xff] %v306_v63 }
  0x32   : > { %339 = vst [vmem:[%s491_s25 + $0xe8] sm:$0xff] %v307_v2 }
  0x33   : > { %340 = vst [vmem:[%s491_s25 + $0xf0] sm:$0xff] %v308_v3 }
  0x34   : > { %341 = vst [vmem:[%s491_s25 + $0xf8] sm:$0xff] %v309_v4 }
  0x35 PF: > { %s13_s12 = sadd.s32 1, %s425_s12  }
  0x36   : > { %p10_p4 = scmp.ge.s32.totalorder %s13_s12, 4  }
  0x38   :  { %12 = sbr.rel (!%p10_p4) target bundleno = 1 (0x1), region = 62 }

// kernel: conv_bn_relu.2
= control target key start
LH: loop header
LB: loop body
LE: loop exit
PB: predicated region body
PF: predicated region fallthrough
CT: control target
= control target key end

     0   :  { %s959_s15 = smov 0   ;;  %s1181_s0 = inlined_call_operand.vmem [shape: bf16[512,128], index: 0, kind: input, shape index: {}]   ;;  %s1182_s1 = inlined_call_operand.vmem [shape: bf16[128,128], index: 1, kind: input, shape index: {}]   ;;  %s1183_s2 = inlined_call_operand.vmem [shape: f32[512,128], index: 2, kind: output, shape index: {0}]   ;;  %s1184_s3 = inlined_call_operand.vmem [shape: f32[16,128], index: 3, kind: output, shape index: {1}]   ;;  %s1185_s4 = inlined_call_operand.vmem [shape: f32[16,128], index: 4, kind: output, shape index: {2}]  }
   0x1 LB: > { %s965_s16 = sadd.s32 4294967295, %s932_s15   ;;  %p765_p0 = scmp.ge.s32.totalorder %s932_s15, 1  ;;  %s932_s15 = sphi %s959_s15, %s15_s15  }
   0x2   : > { %p168_p1 = scmp.lt.s32.totalorder %s932_s15, 3 }
   0x4   : > { %p169_p2 = pnand %p765_p0, %p168_p1 }
   0x5   : > { %s766_s25 = sshll.u32 (!%p169_p2), %s965_s16, 5  ;;  %p214_p4 = scmp.lt.s32.totalorder (!%p169_p2), %s965_s16, 1 }
   0x6   : > { %172 = sbr.rel (%p169_p2) target bundleno = 290 (0x122), region = 28  ;;  %p203_p3 = scmp.lt.s32.totalorder (!%p169_p2), %s766_s25, 63 }
   0xb   : > { %v893_v0 = vld [vmem:[%s1182_s1 + $0x38] sm:$0xff]  ;;  %v892_v1 = vld [vmem:[%s1182_s1 + $0x30] sm:$0xff]  ;;  %v891_v2 = vld [vmem:[%s1182_s1 + $0x28] sm:$0xff]  ;;  %s1187_s25 = smov (!%p203_p3, %s766_s25), 63  ;;  %s1189_s16 = smov (!%p214_p4, %s965_s16), 1 }
   0xc   : > { %414 = vmatpush.bf16.msra.mxu0 %v893_v0  ;;  %894 = vmatpush.bf16.msra.mxu1 %v893_v0  ;;  %v890_v3 = vld [vmem:[%s1182_s1 + $0x20] sm:$0xff]  ;;  %v889_v4 = vld [vmem:[%s1182_s1 + $0x18] sm:$0xff]  ;;  %v888_v5 = vld [vmem:[%s1182_s1 + $0x10] sm:$0xff]  ;;  %s767_s6 = sshll.u32 %s1187_s25, 2  ;;  %s769_s12 = sshll.u32 %s1187_s25, 3 }
   0xd   : > { %895 = vmatpush.bf16.msra.mxu2 %v893_v0  ;;  %896 = vmatpush.bf16.msra.mxu3 %v893_v0  ;;  %v887_v6 = vld [vmem:[%s1182_s1 + $0x8] sm:$0xff]  ;;  %v886_v7 = vld [vmem:[%s1182_s1] sm:$0xff]  ;;  %s1000_s11 = scalar_lea.vmem %s1181_s0, %s767_s6  ;;  %s1022_s17 = scalar_lea.vmem %s1183_s2, %s769_s12 }
   0xe   : > { %v870_v8 = vld [vmem:[%s1000_s11] sm:$0xff]  ;;  %v871_v12 = vld [vmem:[%s1000_s11 + $0x8] sm:$0xff]  ;;  %v872_v16 = vld [vmem:[%s1000_s11 + $0x10] sm:$0xff]  ;;  %s770_s18 = sshll.u32 %s1189_s16, 3 }
   0xf   : > { %v874_v9 = vld [vmem:[%s1000_s11 + $0x20] sm:$0xff]  ;;  %v875_v13 = vld [vmem:[%s1000_s11 + $0x28] sm:$0xff]  ;;  %v876_v17 = vld [vmem:[%s1000_s11 + $0x30] sm:$0xff]  ;;  %s217_s21 = scalar_lea.vmem %s1184_s3, %s770_s18  ;;  %s221_s24 = scalar_lea.vmem %s1185_s4, %s770_s18 }
  0x10   : > { %415 = vmatpush.bf16.msra.mxu0 %v892_v1  ;;  %897 = vmatpush.bf16.msra.mxu1 %v892_v1  ;;  %v878_v10 = vld [vmem:[%s1000_s11 + $0x40] sm:$0xff]  ;;  %v879_v14 = vld [vmem:[%s1000_s11 + $0x48] sm:$0xff]  ;;  %v880_v18 = vld [vmem:[%s1000_s11 + $0x50] sm:$0xff] }
  0x11   : > { %898 = vmatpush.bf16.msra.mxu2 %v892_v1  ;;  %899 = vmatpush.bf16.msra.mxu3 %v892_v1  ;;  %v882_v11 = vld [vmem:[%s1000_s11 + $0x60] sm:$0xff]  ;;  %v883_v15 = vld [vmem:[%s1000_s11 + $0x68] sm:$0xff]  ;;  %v884_v19 = vld [vmem:[%s1000_s11 + $0x70] sm:$0xff] }
  0x12   : > { %v873_v20 = vld [vmem:[%s1000_s11 + $0x18] sm:$0xff] }
  0x13   : > { %v877_v21 = vld [vmem:[%s1000_s11 + $0x38] sm:$0xff] }
  0x14   : > { %416 = vmatpush.bf16.msra.mxu0 %v891_v2  ;;  %900 = vmatpush.bf16.msra.mxu1 %v891_v2  ;;  %v881_v22 = vld [vmem:[%s1000_s11 + $0x58] sm:$0xff] }
  0x15   : > { %901 = vmatpush.bf16.msra.mxu2 %v891_v2  ;;  %902 = vmatpush.bf16.msra.mxu3 %v891_v2  ;;  %v885_v23 = vld [vmem:[%s1000_s11 + $0x78] sm:$0xff] }
  0x18   : > { %417 = vmatpush.bf16.msra.mxu0 %v890_v3  ;;  %903 = vmatpush.bf16.msra.mxu1 %v890_v3 }
  0x19   : > { %904 = vmatpush.bf16.msra.mxu2 %v890_v3  ;;  %905 = vmatpush.bf16.msra.mxu3 %v890_v3 }
  0x1c   : > { %418 = vmatpush.bf16.msra.mxu0 %v889_v4  ;;  %906 = vmatpush.bf16.msra.mxu1 %v889_v4 }
  0x1d   : > { %907 = vmatpush.bf16.msra.mxu2 %v889_v4  ;;  %908 = vmatpush.bf16.msra.mxu3 %v889_v4 }
  0x20   : > { %419 = vmatpush.bf16.msra.mxu0 %v888_v5  ;;  %909 = vmatpush.bf16.msra.mxu1 %v888_v5 }
  0x21   : > { %910 = vmatpush.bf16.msra.mxu2 %v888_v5  ;;  %911 = vmatpush.bf16.msra.mxu3 %v888_v5 }
  0x24   : > { %420 = vmatpush.bf16.msra.mxu0 %v887_v6  ;;  %912 = vmatpush.bf16.msra.mxu1 %v887_v6 }
  0x25   : > { %913 = vmatpush.bf16.msra.mxu2 %v887_v6  ;;  %914 = vmatpush.bf16.msra.mxu3 %v887_v6 }
  0x28   : > { %421 = vmatpush.bf16.msra.mxu0 %v886_v7  ;;  %915 = vmatpush.bf16.msra.mxu1 %v886_v7 }
  0x29   : > { %916 = vmatpush.bf16.msra.mxu2 %v886_v7  ;;  %917 = vmatpush.bf16.msra.mxu3 %v886_v7 }
  0x2b   : > { %422 = vmatmul.bf16.vlgmr.msra.gmra.mxu0 %v870_v8  ;;  %442 = vmatmul.bf16.vlgmr.msra.gmra.mxu1 %v874_v9 }
  0x2c   : > { %462 = vmatmul.bf16.vlgmr.msra.gmra.mxu2 %v878_v10  ;;  %482 = vmatmul.bf16.vlgmr.msra.gmra.mxu3 %v882_v11 }
  0x3b   : > { %427 = vmatmul.bf16.gmra.mxu0 %v871_v12  ;;  %447 = vmatmul.bf16.gmra.mxu1 %v875_v13 }
  0x3c   : > { %467 = vmatmul.bf16.gmra.mxu2 %v879_v14  ;;  %487 = vmatmul.bf16.gmra.mxu3 %v883_v15 }
  0x4b   : > { %432 = vmatmul.bf16.gmra.mxu0 %v872_v16  ;;  %452 = vmatmul.bf16.gmra.mxu1 %v876_v17 }
  0x4c   : > { %472 = vmatmul.bf16.gmra.mxu2 %v880_v18  ;;  %492 = vmatmul.bf16.gmra.mxu3 %v884_v19 }
  0x5b   : > { %437 = vmatmul.bf16.gmra.mxu0 %v873_v20  ;;  %457 = vmatmul.bf16.gmra.mxu1 %v877_v21 }
  0x5c   : > { %477 = vmatmul.bf16.gmra.mxu2 %v881_v22  ;;  %497 = vmatmul.bf16.gmra.mxu3 %v885_v23 }
  0xa8   : > { %v423_v24 = vpop.f32.mrf.mxu0  ;;  %v1024_v25 = vpop.f32.mrf.mxu1 }
  0xa9   : > { %503 = vst [vmem:[%s1022_s17] sm:$0xff] %v423_v24  ;;  %v572_v47 = vmul.f32 %v423_v24, %v423_v24  ;;  %v580_v11 = vmul.f32 %v1024_v25, %v1024_v25 }
  0xaa   : > { %511 = vst [vmem:[%s1022_s17 + $0x40] sm:$0xff] %v1024_v25 }
  0xaf   : > { %v1029_v26 = vpop.f32.mrf.mxu2  ;;  %v1036_v29 = vpop.f32.mrf.mxu3 }
  0xb0   : > { %v425_v27 = vpop.f32.mrf.mxu0  ;;  %v1031_v28 = vpop.f32.mrf.mxu1  ;;  %519 = vst [vmem:[%s1022_s17 + $0x80] sm:$0xff] %v1029_v26 }
  0xb1   : > { %504 = vst [vmem:[%s1022_s17 + $0x8] sm:$0xff] %v425_v27  ;;  %v573_v46 = vmul.f32 %v425_v27, %v425_v27  ;;  %v535_v48 = vadd.f32 %v425_v27, %v423_v24  ;;  %v581_v14 = vmul.f32 %v1031_v28, %v1031_v28 }
  0xb2   : > { %512 = vst [vmem:[%s1022_s17 + $0x48] sm:$0xff] %v1031_v28 }
  0xb3   : > { %527 = vst [vmem:[%s1022_s17 + $0xc0] sm:$0xff] %v1036_v29  ;;  %v604_v50 = vadd.f32 %v573_v46, %v572_v47 }
  0xb7   : > { %v1042_v30 = vpop.f32.mrf.mxu2  ;;  %v1049_v33 = vpop.f32.mrf.mxu3 }
  0xb8   : > { %v428_v31 = vpop.f32.mrf.mxu0  ;;  %v1044_v32 = vpop.f32.mrf.mxu1  ;;  %520 = vst [vmem:[%s1022_s17 + $0x88] sm:$0xff] %v1042_v30 }
  0xb9   : > { %505 = vst [vmem:[%s1022_s17 + $0x10] sm:$0xff] %v428_v31  ;;  %v574_v49 = vmul.f32 %v428_v31, %v428_v31  ;;  %v536_v51 = vadd.f32 %v535_v48, %v428_v31  ;;  %v582_v17 = vmul.f32 %v1044_v32, %v1044_v32 }
  0xba   : > { %513 = vst [vmem:[%s1022_s17 + $0x50] sm:$0xff] %v1044_v32 }
  0xbb   : > { %528 = vst [vmem:[%s1022_s17 + $0xc8] sm:$0xff] %v1049_v33  ;;  %v605_v56 = vadd.f32 %v604_v50, %v574_v49  ;;  %v588_v49 = vmul.f32 %v1029_v26, %v1029_v26 }
  0xbf   : > { %v1055_v34 = vpop.f32.mrf.mxu2  ;;  %v1062_v37 = vpop.f32.mrf.mxu3 }
  0xc0   : > { %v430_v35 = vpop.f32.mrf.mxu0  ;;  %v1057_v36 = vpop.f32.mrf.mxu1  ;;  %521 = vst [vmem:[%s1022_s17 + $0x90] sm:$0xff] %v1055_v34 }
  0xc1   : > { %506 = vst [vmem:[%s1022_s17 + $0x18] sm:$0xff] %v430_v35  ;;  %v575_v52 = vmul.f32 %v430_v35, %v430_v35  ;;  %v537_v57 = vadd.f32 %v536_v51, %v430_v35  ;;  %v583_v21 = vmul.f32 %v1057_v36, %v1057_v36 }
  0xc2   : > { %514 = vst [vmem:[%s1022_s17 + $0x58] sm:$0xff] %v1057_v36 }
  0xc3   : > { %529 = vst [vmem:[%s1022_s17 + $0xd0] sm:$0xff] %v1062_v37  ;;  %v606_v60 = vadd.f32 %v605_v56, %v575_v52 }
  0xc7   : > { %v1068_v38 = vpop.f32.mrf.mxu2  ;;  %v1075_v41 = vpop.f32.mrf.mxu3 }
  0xc8   : > { %v433_v39 = vpop.f32.mrf.mxu0  ;;  %v1070_v40 = vpop.f32.mrf.mxu1  ;;  %522 = vst [vmem:[%s1022_s17 + $0x98] sm:$0xff] %v1068_v38 }
  0xc9   : > { %507 = vst [vmem:[%s1022_s17 + $0x20] sm:$0xff] %v433_v39  ;;  %v576_v58 = vmul.f32 %v433_v39, %v433_v39  ;;  %v538_v61 = vadd.f32 %v537_v57, %v433_v39  ;;  %v591_v57 = vmul.f32 %v1068_v38, %v1068_v38 }
  0xca   : > { %515 = vst [vmem:[%s1022_s17 + $0x60] sm:$0xff] %v1070_v40 }
  0xcb   : > { %530 = vst [vmem:[%s1022_s17 + $0xd8] sm:$0xff] %v1075_v41  ;;  %v607_v63 = vadd.f32 %v606_v60, %v576_v58 }
  0xcf   : > { %v1081_v42 = vpop.f32.mrf.mxu2  ;;  %v1088_v45 = vpop.f32.mrf.mxu3 }
  0xd0   : > { %v435_v43 = vpop.f32.mrf.mxu0  ;;  %v1083_v44 = vpop.f32.mrf.mxu1  ;;  %523 = vst [vmem:[%s1022_s17 + $0xa0] sm:$0xff] %v1081_v42 }
  0xd1   : > { %508 = vst [vmem:[%s1022_s17 + $0x28] sm:$0xff] %v435_v43  ;;  %v577_v62 = vmul.f32 %v435_v43, %v435_v43  ;;  %v539_v0 = vadd.f32 %v538_v61, %v435_v43  ;;  %v585_v31 = vmul.f32 %v1083_v44, %v1083_v44 }
  0xd2   : > { %516 = vst [vmem:[%s1022_s17 + $0x68] sm:$0xff] %v1083_v44 }
  0xd3   : > { %531 = vst [vmem:[%s1022_s17 + $0xe0] sm:$0xff] %v1088_v45  ;;  %v608_v2 = vadd.f32 %v607_v63, %v577_v62 }
  0xd7   : > { %v1094_v53 = vpop.f32.mrf.mxu2  ;;  %v1099_v59 = vpop.f32.mrf.mxu3 }
  0xd8   : > { %v438_v54 = vpop.f32.mrf.mxu0  ;;  %v458_v55 = vpop.f32.mrf.mxu1  ;;  %524 = vst [vmem:[%s1022_s17 + $0xa8] sm:$0xff] %v1094_v53  ;;  %v593_v63 = vmul.f32 %v1094_v53, %v1094_v53 }
  0xd9   : > { %509 = vst [vmem:[%s1022_s17 + $0x30] sm:$0xff] %v438_v54  ;;  %v578_v1 = vmul.f32 %v438_v54, %v438_v54  ;;  %v540_v3 = vadd.f32 %v539_v0, %v438_v54  ;;  %v586_v43 = vmul.f32 %v458_v55, %v458_v55 }
  0xda   : > { %517 = vst [vmem:[%s1022_s17 + $0x70] sm:$0xff] %v458_v55 }
  0xdb   : > { %532 = vst [vmem:[%s1022_s17 + $0xe8] sm:$0xff] %v1099_v59  ;;  %v609_v7 = vadd.f32 %v608_v2, %v578_v1 }
  0xdf   : > { %v478_v4 = vpop.f32.mrf.mxu2  ;;  %v1106_v10 = vpop.f32.mrf.mxu3 }
  0xe0   : > { %v440_v5 = vpop.f32.mrf.mxu0  ;;  %v460_v6 = vpop.f32.mrf.mxu1  ;;  %525 = vst [vmem:[%s1022_s17 + $0xb0] sm:$0xff] %v478_v4  ;;  %v594_v2 = vmul.f32 %v478_v4, %v478_v4 }
  0xe1   : > { %510 = vst [vmem:[%s1022_s17 + $0x38] sm:$0xff] %v440_v5  ;;  %v541_v8 = vadd.f32 %v540_v3, %v440_v5  ;;  %v579_v9 = vmul.f32 %v440_v5, %v440_v5 }
  0xe2   : > { %518 = vst [vmem:[%s1022_s17 + $0x78] sm:$0xff] %v460_v6 }
  0xe3   : > { %v542_v12 = vadd.f32 %v541_v8, %v1024_v25  ;;  %v610_v13 = vadd.f32 %v609_v7, %v579_v9  ;;  %533 = vst [vmem:[%s1022_s17 + $0xf0] sm:$0xff] %v1106_v10  ;;  %v584_v25 = vmul.f32 %v1070_v40, %v1070_v40 }
  0xe5   : > { %v543_v15 = vadd.f32 %v542_v12, %v1031_v28  ;;  %v611_v16 = vadd.f32 %v610_v13, %v580_v11  ;;  %v599_v13 = vmul.f32 %v1075_v41, %v1075_v41 }
  0xe7   : > { %v544_v18 = vadd.f32 %v543_v15, %v1044_v32  ;;  %v612_v19 = vadd.f32 %v611_v16, %v581_v14  ;;  %v480_v20 = vpop.f32.mrf.mxu2  ;;  %v500_v24 = vpop.f32.mrf.mxu3  ;;  %v600_v15 = vmul.f32 %v1088_v45, %v1088_v45 }
  0xe8   : > { %526 = vst [vmem:[%s1022_s17 + $0xb8] sm:$0xff] %v480_v20 }
  0xe9   : > { %v613_v22 = vadd.f32 %v612_v19, %v582_v17  ;;  %v545_v23 = vadd.f32 %v544_v18, %v1057_v36  ;;  %534 = vst [vmem:[%s1022_s17 + $0xf8] sm:$0xff] %v500_v24  ;;  %v587_v36 = vmul.f32 %v460_v6, %v460_v6  ;;  %v601_v18 = vmul.f32 %v1099_v59, %v1099_v59 }
  0xeb   : > { %v546_v27 = vadd.f32 %v545_v23, %v1070_v40  ;;  %v614_v28 = vadd.f32 %v613_v22, %v583_v21  ;;  %v589_v40 = vmul.f32 %v1042_v30, %v1042_v30  ;;  %v602_v21 = vmul.f32 %v1106_v10, %v1106_v10 }
  0xec   : > { %v603_v23 = vmul.f32 %v500_v24, %v500_v24 }
  0xed   : > { %v547_v32 = vadd.f32 %v546_v27, %v1083_v44  ;;  %v615_v35 = vadd.f32 %v614_v28, %v584_v25  ;;  %v590_v44 = vmul.f32 %v1055_v34, %v1055_v34 }
  0xef   : > { %v548_v39 = vadd.f32 %v547_v32, %v458_v55  ;;  %v616_v46 = vadd.f32 %v615_v35, %v585_v31 }
  0xf1   : > { %v617_v47 = vadd.f32 %v616_v46, %v586_v43  ;;  %v549_v48 = vadd.f32 %v548_v39, %v460_v6  ;;  %v595_v6 = vmul.f32 %v480_v20, %v480_v20 }
  0xf3   : > { %v550_v50 = vadd.f32 %v549_v48, %v1029_v26  ;;  %v618_v51 = vadd.f32 %v617_v47, %v587_v36  ;;  %v592_v26 = vmul.f32 %v1081_v42, %v1081_v42 }
  0xf5   : > { %v551_v52 = vadd.f32 %v550_v50, %v1042_v30  ;;  %v619_v54 = vadd.f32 %v618_v51, %v588_v49 }
  0xf7   : > { %v552_v55 = vadd.f32 %v551_v52, %v1055_v34  ;;  %v620_v56 = vadd.f32 %v619_v54, %v589_v40 }
  0xf9   : > { %v621_v58 = vadd.f32 %v620_v56, %v590_v44  ;;  %v553_v60 = vadd.f32 %v552_v55, %v1068_v38  ;;  %v596_v38 = vmul.f32 %v1036_v29, %v1036_v29 }
  0xfb   : > { %v554_v61 = vadd.f32 %v553_v60, %v1081_v42  ;;  %v622_v62 = vadd.f32 %v621_v58, %v591_v57  ;;  %v597_v42 = vmul.f32 %v1049_v33, %v1049_v33 }
  0xfd   : > { %v555_v30 = vadd.f32 %v554_v61, %v1094_v53  ;;  %v623_v0 = vadd.f32 %v622_v62, %v592_v26  ;;  %v598_v53 = vmul.f32 %v1062_v37, %v1062_v37 }
  0xff   : > { %v624_v34 = vadd.f32 %v623_v0, %v593_v63  ;;  %v556_v1 = vadd.f32 %v555_v30, %v478_v4 }
 0x101   : > { %v625_v3 = vadd.f32 %v624_v34, %v594_v2  ;;  %v557_v5 = vadd.f32 %v556_v1, %v480_v20 }
 0x103   : > { %v558_v7 = vadd.f32 %v557_v5, %v1036_v29  ;;  %v626_v8 = vadd.f32 %v625_v3, %v595_v6 }
 0x105   : > { %v559_v9 = vadd.f32 %v558_v7, %v1049_v33  ;;  %v627_v11 = vadd.f32 %v626_v8, %v596_v38 }
 0x107   : > { %v560_v4 = vadd.f32 %v559_v9, %v1062_v37  ;;  %v628_v12 = vadd.f32 %v627_v11, %v597_v42 }
 0x109   : > { %v629_v14 = vadd.f32 %v628_v12, %v598_v53  ;;  %v561_v29 = vadd.f32 %v560_v4, %v1075_v41 }
 0x10b   : > { %v562_v33 = vadd.f32 %v561_v29, %v1088_v45  ;;  %v630_v16 = vadd.f32 %v629_v14, %v599_v13 }
 0x10d   : > { %v563_v17 = vadd.f32 %v562_v33, %v1099_v59  ;;  %v631_v37 = vadd.f32 %v630_v16, %v600_v15 }
 0x10f   : > { %v632_v19 = vadd.f32 %v631_v37, %v601_v18  ;;  %v564_v20 = vadd.f32 %v563_v17, %v1106_v10 }
 0x111   : > { %v633_v41 = vadd.f32 %v632_v19, %v602_v21  ;;  %v565_v22 = vadd.f32 %v564_v20, %v500_v24 }
 0x113   : > { %v566_v25 = vrot.slane %v565_v22, 4  ;;  %v634_v27 = vadd.f32 %v633_v41, %v603_v23 }
 0x115   : > { %v567_v45 = vadd.f32 %v566_v25, %v565_v22  ;;  %v635_v28 = vrot.slane %v634_v27, 4 }
 0x117   : > { %v568_v31 = vrot.slane %v567_v45, 2  ;;  %v636_v32 = vadd.f32 %v635_v28, %v634_v27 }
 0x119   : > { %v569_v59 = vadd.f32 %v568_v31, %v567_v45  ;;  %v637_v35 = vrot.slane %v636_v32, 2 }
 0x11b   : > { %v570_v39 = vrot.slane %v569_v59, 1  ;;  %v638_v43 = vadd.f32 %v637_v35, %v636_v32 }
 0x11d   : > { %v571_v10 = vadd.f32 %v570_v39, %v569_v59  ;;  %v639_v46 = vrot.slane %v638_v43, 1 }
 0x11f   : > { %v640_v24 = vadd.f32 %v639_v46, %v638_v43  ;;  %641 = vst [vmem:[%s217_s21] sm:$0xff] %v571_v10 }
 0x121   : > { %642 = vst [vmem:[%s221_s24] sm:$0xff] %v640_v24 }
 0x122 PF: > { %s15_s15 = sadd.s32 1, %s932_s15  }
 0x123   : > { %p12_p5 = scmp.ge.s32.totalorder %s15_s15, 4  }
 0x125   :  { %14 = sbr.rel (!%p12_p5) target bundleno = 1 (0x1), region = 82 }

</bundles_post_ra>
